<compile_context>
chip_gen: v5e
topology: v5e:2x2
jax: 0.10.0
libtpu: 0.0.40
codegen_flags: <defaults>
</compile_context>

<pallas_src>
import functools
import math

import jax
import jax.numpy as jnp
from jax import lax
from jax.experimental import pallas as pl
from jax.experimental.pallas import tpu as pltpu

_LANES = 128


def _cdiv(a, b):
    return -(-a // b)


def _round_up(a, b):
    return _cdiv(a, b) * b


def _norm_p(p):
    fp = float(p)
    return int(fp) if fp.is_integer() else fp


# ---------------------------------------------------------------------------
# Fused DiceLoss kernel: softmax + one-hot + per-class dice partial sums.
# ---------------------------------------------------------------------------
def _fused_dice_kernel(logits_ref, labels_ref, num_ref, den_ref, *,
                       p, hw, t_hw, j_per_split):
    """logits_ref : (1, C, T_HW) raw logits tile.
       labels_ref : (1, 1, T_HW) int32 class-id tile.
       num_ref    : (1, C, 1) f32 accumulator, resident across reduction axis.
       den_ref    : (1, C, 1) f32 accumulator.
    """
    s = pl.program_id(1)
    j = pl.program_id(2)

    @pl.when(j == 0)
    def _():
        num_ref[...] = jnp.zeros_like(num_ref)
        den_ref[...] = jnp.zeros_like(den_ref)

    x = logits_ref[0].astype(jnp.float32)          # (C, T_HW)
    lab = labels_ref[0]                            # (1, T_HW) int32
    c = x.shape[0]

    # Valid-lane mask from the LOGICAL global element position.  Handles the
    # ragged tail tile and the clamped duplicate blocks of the split axis.
    blk = s * j_per_split + j
    pos = blk * t_hw + lax.broadcasted_iota(jnp.int32, (1, t_hw), 1)
    valid = pos < hw                               # (1, T_HW) bool
    valid_f = valid.astype(jnp.float32)

    # Mask block padding before softmax (its content is unspecified).
    x = jnp.where(valid, x, 0.0)

    # Softmax across the (small) class axis, in-register.
    m = jnp.max(x, axis=0, keepdims=True)          # (1, T_HW)
    e = jnp.exp(x - m)                             # (C, T_HW)
    probs = (e / jnp.sum(e, axis=0, keepdims=True)) * valid_f

    # One-hot target straight from the integer labels (never hits HBM as f32).
    cls = lax.broadcasted_iota(jnp.int32, (c, t_hw), 0)
    onehot = jnp.where((lab == cls) & valid, 1.0, 0.0)   # (C, T_HW) f32

    num_ref[...] += jnp.sum(probs * onehot, axis=1, keepdims=True)[None]
    # onehot**p == onehot for p > 0 (entries are 0/1); masked zeros add 0.
    if p == 1:
        dterm = probs + onehot
    elif p == 2:
        dterm = probs * probs + onehot
    else:
        dterm = probs ** p + onehot
    den_ref[...] += jnp.sum(dterm, axis=1, keepdims=True)[None]


def _fused_dice_sums(logits, labels, *, p, block_bytes):
    """Per-(sample, class) dice sums for the fused DiceLoss path.

    logits: [N, C, HW] float; labels: [N, 1, HW] int32.
    Returns (num, den), each [N, C] float32:
      num[n, c] = sum_hw softmax(logits)[n, c] * (labels[n] == c)
      den[n, c] = sum_hw softmax(logits)[n, c]**p + (labels[n] == c)
    """
    n, c, hw = logits.shape
    itemsize = jnp.dtype(logits.dtype).itemsize

    # Adaptive feature tiling: balance tiles so the last tile is nearly full.
    cols_total = _cdiv(hw, _LANES)
    budget_cols = max(1, block_bytes // (c * _LANES * itemsize))
    n_steps = _cdiv(cols_total, budget_cols)
    cols = _cdiv(cols_total, n_steps)
    t_hw = cols * _LANES
    nblocks = _cdiv(cols_total, cols)

    # Keep both v7x TensorCores busy when N is 1/odd: split the reduction axis
    # into `num_splits` parallel chunks with per-chunk partial accumulators.
    num_splits = 2 if (n % 2 == 1 and nblocks >= 2) else 1
    jps = _cdiv(nblocks, num_splits)

    if num_splits == 1:
        def in_map(ni, s, j):
            return (ni, 0, j)
    else:
        def in_map(ni, s, j):
            return (ni, 0, jnp.minimum(s * jps + j, nblocks - 1))

    def out_map(ni, s, j):
        return (ni * num_splits + s, 0, 0)

    logit_blk = c * t_hw * itemsize
    label_blk = t_hw * 4
    vmem = int(min(100 << 20,
                   max(16 << 20, 4 * (logit_blk + label_blk) + (8 << 20))))

    kernel = functools.partial(_fused_dice_kernel, p=p, hw=hw, t_hw=t_hw,
                               j_per_split=jps)
    num, den = pl.pallas_call(
        kernel,
        out_shape=(jax.ShapeDtypeStruct((n * num_splits, c, 1), jnp.float32),
                   jax.ShapeDtypeStruct((n * num_splits, c, 1), jnp.float32)),
        grid_spec=pltpu.PrefetchScalarGridSpec(
            num_scalar_prefetch=0,
            grid=(n, num_splits, jps),
            in_specs=[
                pl.BlockSpec((1, c, t_hw), in_map),
                pl.BlockSpec((1, 1, t_hw), in_map),
            ],
            out_specs=[
                pl.BlockSpec((1, c, 1), out_map),
                pl.BlockSpec((1, c, 1), out_map),
            ],
        ),
        compiler_params=pltpu.CompilerParams(
            dimension_semantics=("parallel", "parallel", "arbitrary"),
            vmem_limit_bytes=vmem,
        ),
    )(logits, labels)

    num = jnp.sum(num.reshape(n, num_splits, c), axis=1)
    den = jnp.sum(den.reshape(n, num_splits, c), axis=1)
    return num, den


# ---------------------------------------------------------------------------
# Generic BinaryDiceLoss kernel over [rows, D] pairs (standalone module).
# ---------------------------------------------------------------------------
def _binary_dice_kernel(x_ref, y_ref, num_ref, den_ref, *, p, d, t_d):
    """x_ref, y_ref     : (RB, T_D) tiles of the [rows, D] inputs.
       num_ref, den_ref : (RB, 1) f32 accumulators resident across reduction.
    """
    j = pl.program_id(1)

    @pl.when(j == 0)
    def _():
        num_ref[...] = jnp.zeros_like(num_ref)
        den_ref[...] = jnp.zeros_like(den_ref)

    x = x_ref[...].astype(jnp.float32)
    y = y_ref[...].astype(jnp.float32)

    # In-kernel tail mask (no padded HBM copy of the inputs).
    pos = j * t_d + lax.broadcasted_iota(jnp.int32, x.shape, 1)
    valid = pos < d
    x = jnp.where(valid, x, 0.0)
    y = jnp.where(valid, y, 0.0)

    num_ref[...] += jnp.sum(x * y, axis=1, keepdims=True)
    if p == 1:
        dterm = x + y
    elif p == 2:
        dterm = x * x + y * y
    else:
        dterm = x ** p + y ** p       # masked zeros: 0**p == 0 for p > 0
    den_ref[...] += jnp.sum(dterm, axis=1, keepdims=True)


def _binary_dice_sums(x2, y2, *, p, block_bytes):
    assert x2.shape == y2.shape
    rows, d = x2.shape
    itemsize = max(jnp.dtype(x2.dtype).itemsize, jnp.dtype(y2.dtype).itemsize)

    cols_total = _cdiv(d, _LANES)
    budget_cols = max(1, block_bytes // (8 * _LANES * itemsize))
    if cols_total > budget_cols:
        # Tile the feature axis; balance so the last tile is nearly full.
        n_steps = _cdiv(cols_total, budget_cols)
        t_d = _cdiv(cols_total, n_steps) * _LANES
        rb = 8 if rows >= 8 else rows
    else:
        # Whole feature dim per step; batch rows to amortize per-step overhead.
        t_d = cols_total * _LANES
        if rows < 8:
            rb = rows
        else:
            rb = max(8, (block_bytes // (t_d * itemsize)) // 8 * 8)
            rb = min(rb, _round_up(rows, 8))

    grid = (_cdiv(rows, rb), _cdiv(d, t_d))
    blk_bytes = rb * t_d * itemsize
    vmem = int(min(100 << 20, max(16 << 20, 4 * blk_bytes + (8 << 20))))

    kernel = functools.partial(_binary_dice_kernel, p=p, d=d, t_d=t_d)
    num, den = pl.pallas_call(
        kernel,
        out_shape=(jax.ShapeDtypeStruct((rows, 1), jnp.float32),
                   jax.ShapeDtypeStruct((rows, 1), jnp.float32)),
        grid_spec=pltpu.PrefetchScalarGridSpec(
            num_scalar_prefetch=0,
            grid=grid,
            in_specs=[
                pl.BlockSpec((rb, t_d), lambda i, j: (i, j)),
                pl.BlockSpec((rb, t_d), lambda i, j: (i, j)),
            ],
            out_specs=[
                pl.BlockSpec((rb, 1), lambda i, j: (i, 0)),
                pl.BlockSpec((rb, 1), lambda i, j: (i, 0)),
            ],
        ),
        compiler_params=pltpu.CompilerParams(
            dimension_semantics=("parallel", "arbitrary"),
            vmem_limit_bytes=vmem,
        ),
    )(x2, y2)
    return num[:, 0], den[:, 0]


# ---------------------------------------------------------------------------
# Module-equivalent wrappers.
# ---------------------------------------------------------------------------
def _apply_reduction(loss, reduction):
    if reduction == "mean":
        return jnp.mean(loss)
    elif reduction == "sum":
        return jnp.sum(loss)
    elif reduction == "none":
        return loss
    raise Exception("Unexpected reduction {}".format(reduction))


def binary_dice_loss(predict, target, *, smooth=1e-08, p=1, reduction="mean",
                     block_bytes=4 << 20):
    """BinaryDiceLoss.forward."""
    assert predict.shape[0] == target.shape[0], \
        "predict & target batch size don't match"
    n = predict.shape[0]
    pred2 = predict.reshape(n, -1)
    targ2 = target.reshape(n, -1)
    num, den = _binary_dice_sums(pred2, targ2, p=_norm_p(p),
                                 block_bytes=block_bytes)
    loss = 1.0 - (2.0 * num + smooth) / (den + smooth)
    return _apply_reduction(loss, reduction)


def dice_loss(predict, target, *, weight=None, ignore_index=None,
              smooth=1e-08, p=1, block_bytes=4 << 20):
    """DiceLoss.forward (softmax + make_one_hot + per-class BinaryDiceLoss,
    fully fused into one Pallas pass over the logits + label map).

    predict: [N, C, *spatial] float logits; target: [N, *spatial] integer ids.
    """
    n, c = predict.shape[0], predict.shape[1]
    hw = int(math.prod(predict.shape[2:]))
    logits = predict.reshape(n, c, hw)
    # TODO(synk): labels outside [0, C) become all-zero one-hot rows here
    # (PyTorch's scatter-based make_one_hot would instead error); predictions
    # at those pixels still count in every class's denominator.
    labels = target.reshape(n, 1, hw).astype(jnp.int32)
    num, den = _fused_dice_sums(logits, labels, p=_norm_p(p),
                                block_bytes=block_bytes)
    per_row = 1.0 - (2.0 * num + smooth) / (den + smooth)   # [N, C]
    per_class = jnp.mean(per_row, axis=0)                   # reduction='mean'
    if weight is not None:
        per_class = per_class * jnp.asarray(weight, per_class.dtype)
    if ignore_index is not None:
        mask = jnp.ones((c,), per_class.dtype).at[ignore_index].set(0.0)
        per_class = per_class * mask
    return jnp.sum(per_class) / c


if __name__ == "__main__":
    key = jax.random.PRNGKey(0)
    k1, k2, k3, k4, k5, k6, k7, k8 = jax.random.split(key, 8)

    def dice_ref(logits, labels, *, weight=None, ignore_index=None,
                 smooth=1e-08, p=1):
        n, c = logits.shape[0], logits.shape[1]
        probs = jax.nn.softmax(logits, axis=1)
        onehot = (labels[:, None].astype(jnp.int32) ==
                  jnp.arange(c).reshape((1, c) + (1,) * (labels.ndim - 1))
                  ).astype(jnp.float32)
        total = 0.0
        for i in range(c):
            if i == ignore_index:
                continue
            pf = probs[:, i].reshape(n, -1)
            tf = onehot[:, i].reshape(n, -1)
            num = 2.0 * jnp.sum(pf * tf, axis=1) + smooth
            den = jnp.sum(pf ** p + tf ** p, axis=1) + smooth
            li = jnp.mean(1.0 - num / den)
            if weight is not None:
                li = li * weight[i]
            total = total + li
        return total / c

    # 1) Full DiceLoss: [2, 4, 16, 16] logits + [2, 16, 16] labels (HW % 128 == 0).
    logits = jax.random.normal(k1, (2, 4, 16, 16), dtype=jnp.float32)
    labels = jax.random.randint(k2, (2, 16, 16), 0, 4)
    out = jax.block_until_ready(dice_loss(logits, labels, smooth=1e-08, p=1))
    ref = dice_ref(logits, labels, smooth=1e-08, p=1)
    assert jnp.allclose(out, ref, rtol=1e-5, atol=1e-6), (out, ref)

    # 2) N odd + multiple ragged feature tiles -> exercises the in-kernel tail
    #    mask, the feature-axis split (both v7x TCs) with clamped duplicate
    #    blocks, plus weight / ignore_index and the p=2 fast path.
    logits2 = jax.random.normal(k3, (1, 3, 24, 24), dtype=jnp.float32)
    labels2 = jax.random.randint(k4, (1, 24, 24), 0, 3)
    w = [0.5, 1.0, 2.0]
    out2 = jax.block_until_ready(
        dice_loss(logits2, labels2, weight=w, ignore_index=1, smooth=1e-08,
                  p=2, block_bytes=3072))
    ref2 = dice_ref(logits2, labels2, weight=w, ignore_index=1,
                    smooth=1e-08, p=2)
    assert jnp.allclose(out2, ref2, rtol=1e-5, atol=1e-6), (out2, ref2)

    # 3) BinaryDiceLoss alone: feature dim not a multiple of 128 (tail mask)
    #    and the p=2 fast path.
    pred_b = jax.nn.sigmoid(jax.random.normal(k5, (2, 3, 10, 10), jnp.float32))
    targ_b = (jax.random.uniform(k6, (2, 3, 10, 10)) > 0.5).astype(jnp.float32)
    out_b = jax.block_until_ready(
        binary_dice_loss(pred_b, targ_b, smooth=1e-08, p=2, reduction="mean"))
    pf = pred_b.reshape(2, -1)
    tf = targ_b.reshape(2, -1)
    num_b = 2.0 * jnp.sum(pf * tf, axis=1) + 1e-08
    den_b = jnp.sum(pf ** 2 + tf ** 2, axis=1) + 1e-08
    ref_b = jnp.mean(1.0 - num_b / den_b)
    assert jnp.allclose(out_b, ref_b, rtol=1e-5, atol=1e-6), (out_b, ref_b)

    # 4) BinaryDiceLoss with many rows + small feature dim -> multi-row blocks
    #    with a partial last row block; reduction='none'.
    pred_c = jax.nn.sigmoid(jax.random.normal(k7, (10, 200), jnp.float32))
    targ_c = (jax.random.uniform(k8, (10, 200)) > 0.5).astype(jnp.float32)
    out_c = jax.block_until_ready(
        binary_dice_loss(pred_c, targ_c, smooth=1e-08, p=1, reduction="none"))
    num_c = 2.0 * jnp.sum(pred_c * targ_c, axis=1) + 1e-08
    den_c = jnp.sum(pred_c + targ_c, axis=1) + 1e-08
    ref_c = 1.0 - num_c / den_c
    assert jnp.allclose(out_c, ref_c, rtol=1e-5, atol=1e-6), (out_c, ref_c)

    print("KERNEL_OK")
</pallas_src>

<mosaic_0001>
module attributes {stable_mosaic.version = 11 : i64} {
  func.func @_fused_dice_kernel(%arg0: i32, %arg1: i32, %arg2: i32, %arg3: memref<1x4x256xf32, #tpu.memory_space<vmem>>, %arg4: memref<1x1x256xi32, #tpu.memory_space<vmem>>, %arg5: memref<1x4x1xf32, #tpu.memory_space<vmem>>, %arg6: memref<1x4x1xf32, #tpu.memory_space<vmem>>) attributes {dimension_semantics = [#tpu.dimension_semantics<parallel>, #tpu.dimension_semantics<parallel>, #tpu.dimension_semantics<arbitrary>], iteration_bounds = array<i64: 2, 1, 1>, scalar_prefetch = 0 : i64, scratch_operands = 0 : i64, tpu.core_type = #tpu.core_type<tc>, window_params = [{transform_indices = @transform_0, window_bounds = array<i64: 1, 4, 256>}, {transform_indices = @transform_1, window_bounds = array<i64: 1, 1, 256>}, {transform_indices = @transform_2, window_bounds = array<i64: 1, 4, 1>}, {transform_indices = @transform_3, window_bounds = array<i64: 1, 4, 1>}]} {
    %c0_i32 = arith.constant 0 : i32
    %0 = arith.cmpi eq, %arg2, %c0_i32 : i32
    %1 = arith.extui %0 : i1 to i32
    %c0_i32_0 = arith.constant 0 : i32
    %2 = arith.cmpi ne, %1, %c0_i32_0 : i32
    scf.if %2 {
      %cst_25 = arith.constant 0.000000e+00 : f32
      %54 = vector.broadcast %cst_25 : f32 to vector<1x4x1xf32>
      %c0_26 = arith.constant 0 : index
      %c0_27 = arith.constant 0 : index
      %c0_28 = arith.constant 0 : index
      %55 = vector.load %arg5[%c0_26, %c0_27, %c0_28] : memref<1x4x1xf32, #tpu.memory_space<vmem>>, vector<1x4x1xf32>
      tpu.vector_store %arg5[%c0_26, %c0_27, %c0_28], %54 {strides = array<i32>} : memref<1x4x1xf32, #tpu.memory_space<vmem>>, vector<1x4x1xf32>,
      %cst_29 = arith.constant 0.000000e+00 : f32
      %56 = vector.broadcast %cst_29 : f32 to vector<1x4x1xf32>
      %c0_30 = arith.constant 0 : index
      %c0_31 = arith.constant 0 : index
      %c0_32 = arith.constant 0 : index
      %57 = vector.load %arg6[%c0_30, %c0_31, %c0_32] : memref<1x4x1xf32, #tpu.memory_space<vmem>>, vector<1x4x1xf32>
      tpu.vector_store %arg6[%c0_30, %c0_31, %c0_32], %56 {strides = array<i32>} : memref<1x4x1xf32, #tpu.memory_space<vmem>>, vector<1x4x1xf32>,
    } else {
    }
    %c0 = arith.constant 0 : index
    %c0_1 = arith.constant 0 : index
    %c0_2 = arith.constant 0 : index
    %3 = vector.load %arg3[%c0, %c0_1, %c0_2] : memref<1x4x256xf32, #tpu.memory_space<vmem>>, vector<1x4x256xf32>
    %4 = vector.shape_cast %3 : vector<1x4x256xf32> to vector<4x256xf32>
    %c0_3 = arith.constant 0 : index
    %c0_4 = arith.constant 0 : index
    %c0_5 = arith.constant 0 : index
    %5 = vector.load %arg4[%c0_3, %c0_4, %c0_5] : memref<1x1x256xi32, #tpu.memory_space<vmem>>, vector<1x1x256xi32>
    %6 = vector.shape_cast %5 : vector<1x1x256xi32> to vector<1x256xi32>
    %c1_i32 = arith.constant 1 : i32
    %7 = arith.muli %arg1, %c1_i32 : i32
    %8 = arith.addi %7, %arg2 : i32
    %c256_i32 = arith.constant 256 : i32
    %9 = arith.muli %8, %c256_i32 : i32
    %10 = tpu.iota {dimensions = array<i32: 1>} : vector<1x256xi32>
    %11 = vector.broadcast %9 : i32 to vector<1x256xi32>
    %12 = arith.addi %11, %10 : vector<1x256xi32>
    %c256_i32_6 = arith.constant 256 : i32
    %13 = vector.broadcast %c256_i32_6 : i32 to vector<1x256xi32>
    %14 = arith.cmpi slt, %12, %13 : vector<1x256xi32>
    %15 = arith.extui %14 : vector<1x256xi1> to vector<1x256xi32>
    %16 = arith.sitofp %15 : vector<1x256xi32> to vector<1x256xf32>
    %cst = arith.constant 0.000000e+00 : f32
    %17 = vector.shape_cast %14 : vector<1x256xi1> to vector<1x256xi1>
    %18 = vector.broadcast %17 : vector<1x256xi1> to vector<4x256xi1>
    %19 = vector.broadcast %cst : f32 to vector<4x256xf32>
    %20 = arith.select %18, %4, %19 : vector<4x256xi1>, vector<4x256xf32>
    %cst_7 = arith.constant dense<0xFF800000> : vector<256xf32>
    %21 = vector.multi_reduction <maximumf>, %20, %cst_7 [0] : vector<4x256xf32> to vector<256xf32>
    %22 = vector.shape_cast %21 : vector<256xf32> to vector<1x256xf32>
    %23 = vector.broadcast %22 : vector<1x256xf32> to vector<4x256xf32>
    %24 = arith.subf %20, %23 : vector<4x256xf32>
    %25 = math.exp %24 : vector<4x256xf32>
    %cst_8 = arith.constant dense<0.000000e+00> : vector<256xf32>
    %26 = vector.multi_reduction <add>, %25, %cst_8 [0] : vector<4x256xf32> to vector<256xf32>
    %27 = vector.shape_cast %26 : vector<256xf32> to vector<1x256xf32>
    %28 = vector.broadcast %27 : vector<1x256xf32> to vector<4x256xf32>
    %29 = arith.divf %25, %28 : vector<4x256xf32>
    %30 = vector.broadcast %16 : vector<1x256xf32> to vector<4x256xf32>
    %31 = arith.mulf %29, %30 : vector<4x256xf32>
    %32 = tpu.iota {dimensions = array<i32: 0>} : vector<4x256xi32>
    %33 = vector.broadcast %6 : vector<1x256xi32> to vector<4x256xi32>
    %34 = arith.cmpi eq, %33, %32 : vector<4x256xi32>
    %35 = vector.broadcast %14 : vector<1x256xi1> to vector<4x256xi1>
    %36 = arith.andi %34, %35 : vector<4x256xi1>
    %cst_9 = arith.constant 1.000000e+00 : f32
    %cst_10 = arith.constant 0.000000e+00 : f32
    %37 = vector.broadcast %cst_9 : f32 to vector<4x256xf32>
    %38 = vector.broadcast %cst_10 : f32 to vector<4x256xf32>
    %39 = arith.select %36, %37, %38 : vector<4x256xi1>, vector<4x256xf32>
    %c0_11 = arith.constant 0 : index
    %c0_12 = arith.constant 0 : index
    %c0_13 = arith.constant 0 : index
    %40 = vector.load %arg5[%c0_11, %c0_12, %c0_13] : memref<1x4x1xf32, #tpu.memory_space<vmem>>, vector<1x4x1xf32>
    %41 = arith.mulf %31, %39 : vector<4x256xf32>
    %cst_14 = arith.constant dense<0.000000e+00> : vector<4xf32>
    %42 = vector.multi_reduction <add>, %41, %cst_14 [1] : vector<4x256xf32> to vector<4xf32>
    %43 = vector.shape_cast %42 : vector<4xf32> to vector<4x1xf32>
    %44 = vector.shape_cast %43 : vector<4x1xf32> to vector<1x4x1xf32>
    %45 = arith.addf %40, %44 : vector<1x4x1xf32>
    %c0_15 = arith.constant 0 : index
    %c0_16 = arith.constant 0 : index
    %c0_17 = arith.constant 0 : index
    %46 = vector.load %arg5[%c0_15, %c0_16, %c0_17] : memref<1x4x1xf32, #tpu.memory_space<vmem>>, vector<1x4x1xf32>
    tpu.vector_store %arg5[%c0_15, %c0_16, %c0_17], %45 {strides = array<i32>} : memref<1x4x1xf32, #tpu.memory_space<vmem>>, vector<1x4x1xf32>,
    %47 = arith.addf %31, %39 : vector<4x256xf32>
    %c0_18 = arith.constant 0 : index
    %c0_19 = arith.constant 0 : index
    %c0_20 = arith.constant 0 : index
    %48 = vector.load %arg6[%c0_18, %c0_19, %c0_20] : memref<1x4x1xf32, #tpu.memory_space<vmem>>, vector<1x4x1xf32>
    %cst_21 = arith.constant dense<0.000000e+00> : vector<4xf32>
    %49 = vector.multi_reduction <add>, %47, %cst_21 [1] : vector<4x256xf32> to vector<4xf32>
    %50 = vector.shape_cast %49 : vector<4xf32> to vector<4x1xf32>
    %51 = vector.shape_cast %50 : vector<4x1xf32> to vector<1x4x1xf32>
    %52 = arith.addf %48, %51 : vector<1x4x1xf32>
    %c0_22 = arith.constant 0 : index
    %c0_23 = arith.constant 0 : index
    %c0_24 = arith.constant 0 : index
    %53 = vector.load %arg6[%c0_22, %c0_23, %c0_24] : memref<1x4x1xf32, #tpu.memory_space<vmem>>, vector<1x4x1xf32>
    tpu.vector_store %arg6[%c0_22, %c0_23, %c0_24], %52 {strides = array<i32>} : memref<1x4x1xf32, #tpu.memory_space<vmem>>, vector<1x4x1xf32>,
    return
  }
  func.func @transform_0(%arg0: i32, %arg1: i32, %arg2: i32) -> (i32, i32, i32) {
    %c0_i32 = arith.constant 0 : i32
    %c0_i32_0 = arith.constant 0 : i32
    return %arg0, %c0_i32, %arg2 : i32, i32, i32
  }
  func.func @transform_1(%arg0: i32, %arg1: i32, %arg2: i32) -> (i32, i32, i32) {
    %c0_i32 = arith.constant 0 : i32
    %c0_i32_0 = arith.constant 0 : i32
    return %arg0, %c0_i32, %arg2 : i32, i32, i32
  }
  func.func @transform_2(%arg0: i32, %arg1: i32, %arg2: i32) -> (i32, i32, i32) {
    %c1_i32 = arith.constant 1 : i32
    %0 = arith.muli %arg0, %c1_i32 : i32
    %1 = arith.addi %0, %arg1 : i32
    %c0_i32 = arith.constant 0 : i32
    %c0_i32_0 = arith.constant 0 : i32
    %c0_i32_1 = arith.constant 0 : i32
    return %1, %c0_i32, %c0_i32_0 : i32, i32, i32
  }
  func.func @transform_3(%arg0: i32, %arg1: i32, %arg2: i32) -> (i32, i32, i32) {
    %c1_i32 = arith.constant 1 : i32
    %0 = arith.muli %arg0, %c1_i32 : i32
    %1 = arith.addi %0, %arg1 : i32
    %c0_i32 = arith.constant 0 : i32
    %c0_i32_0 = arith.constant 0 : i32
    %c0_i32_1 = arith.constant 0 : i32
    return %1, %c0_i32, %c0_i32_0 : i32, i32, i32
  }
}

</mosaic_0001>

<bundles_post_ra>
// kernel: tpu_custom_call.1
= control target key start
LH: loop header
LB: loop body
LE: loop exit
PB: predicated region body
PF: predicated region fallthrough
CT: control target
= control target key end

     0   :  { %9 = vsyncpa [#allocation3], 0  ;;  %s916_s0 = inlined_call_operand.hbm [shape: f32[2,4,256], index: 0, kind: input, shape index: {}]   ;;  %s917_s1 = inlined_call_operand.hbm [shape: s32[2,1,256], index: 1, kind: input, shape index: {}]   ;;  %s918_s2 = inlined_call_operand.vmem [shape: f32[2,4,1], index: 2, kind: output, shape index: {0}]   ;;  %s919_s3 = inlined_call_operand.vmem [shape: f32[2,4,1], index: 3, kind: output, shape index: {1}]  }
   0x1   :  { %11 = vsyncpa [#allocation3 + $0x1], 0 }
   0x2   :  { %12 = vsyncpa [#allocation5], 0 }
   0x3   :  { %14 = vsyncpa [#allocation5 + $0x1], 0  ;;  %s773_s12 = smov 0   ;;  %s775_s13 = smov 0  }
   0x4   :  { %s777_s14 = smov 0   ;;  %s779_s15 = smov 0  }
   0x5   :  { %s781_s16 = smov 0   ;;  %s783_s17 = smov 0  }
   0x6 LB: > { %s550_s18 = sadd.s32 4294967295, %s750_s17   ;;  %s39_s19 = sadd.s32 1, %s746_s16  ;;  %s750_s17 = sphi %s783_s17, %s20_s17   ;;  %s746_s16 = sphi %s781_s16, %s927_s16   ;;  %s742_s15 = sphi %s779_s15, %s926_s15   ;;  %s738_s14 = sphi %s777_s14, %s925_s14   ;;  %s734_s13 = sphi %s775_s13, %s924_s13   ;;  %s730_s12 = sphi %s773_s12, %s923_s12  }
   0x7   : > { %p41_p0 = scmp.ge.s32.totalorder %s39_s19, 2  ;;  %s48_s20 = sadd.s32 1, %s738_s14 }
   0x8   : > { %p55_p1 = scmp.ne.s32.totalorder %s738_s14, %s734_s13  ;;  %p56_p2 = scmp.eq.s32.totalorder %s750_s17, 0 }
   0x9   : > { %s929_s19 = smov (%p41_p0, %s39_s19), 0  ;;  %p61_p4 = scmp.ne.s32.totalorder %s734_s13, %s730_s12 }
   0xa   : > { %p809_p3 = por %p56_p2, %p55_p1  ;;  %s43_s22 = ssub.s32 %s746_s16, %s929_s19 }
   0xb   : > { %p62_p5 = scmp.eq.s32.totalorder %s550_s18, 0  ;;  %p46_p6 = scmp.eq.s32.totalorder %s43_s22, 0 }
   0xc   : > { %p578_p8 = scmp.lt.s32.totalorder %s750_s17, 2  ;;  %s169_s25 = sand.u32 1, %s738_s14  }
   0xd   : > { %p816_p7 = por %p62_p5, %p61_p4  ;;  %s566_s26 = sshll.u32 %s746_s16, 3 }
   0xe   : > { %s822_s24 = scalar_select %p46_p6, %s738_s14, %s48_s20  }
   0xf   : > { %s554_s27 = sshll.u32 %s169_s25, 3  ;;  %s180_s30 = scalar_lea.hbm %s916_s0, %s566_s26 }
  0x10   : > { %s182_s4 = sshll.u32 %s180_s30, 4  ;;  %s173_s5 = scalar_lea.vmem [#allocation2], %s554_s27  ;;  %s183_s4 = int_to_ptr.hbm [resolvable:$true] %s182_s4 }
  0x11   : > { %s184_s6 = sshll.u32 %s173_s5, 4  ;;  %p831_p9 = pnand %p578_p8, %p809_p3  ;;  %s185_s6 = int_to_ptr.vmem [resolvable:$true] %s184_s6 }
  0x12   : > { %p559_p10 = scmp.ge.s32.totalorder %s750_s17, 1  ;;  %p210_p11 = scmp.lt.s32.totalorder %s750_s17, 3 }
  0x13   : > { %s557_s8 = sshll.u32 %s169_s25, 1  ;;  %s170_s9 = scalar_lea.sflag [#allocation3], %s169_s25 }
  0x14   : > { %574 = dma.hbm_to_vmem [thread:$0]  (!%p831_p9), %s183_s4, 128, %s185_s6, %s170_s9  }
  0x15   : > { %p211_p12 = pnand %p559_p10, %p210_p11  ;;  %s558_s10 = sshll.u32 %s746_s16, 1 }
  0x16   : > { %s195_s11 = scalar_lea.vmem [#allocation4], %s557_s8  ;;  %s201_s21 = scalar_lea.hbm %s917_s1, %s558_s10 }
  0x17   : > { %s205_s12 = sshll.u32 %s195_s11, 4  ;;  %s203_s22 = sshll.u32 %s201_s21, 4  ;;  %s206_s12 = int_to_ptr.vmem [resolvable:$true] %s205_s12  ;;  %s204_s22 = int_to_ptr.hbm [resolvable:$true] %s203_s22 }
  0x18   : > { %s192_s26 = scalar_lea.sflag [#allocation5], %s169_s25  ;;  %214 = sbr.rel (%p211_p12) target bundleno = 231 (0xe7), region = 28 }
  0x19   : > { %577 = dma.hbm_to_vmem [thread:$0]  (!%p831_p9), %s204_s22, 32, %s206_s12, %s192_s26  }
  0x1a   : > { %s216_s27 = sand.u32 (!%p211_p12), 1, %s734_s13  }
  0x1b   : > { %s560_s28 = sshll.u32 (!%p211_p12), %s216_s27, 3  ;;  %s217_s29 = scalar_lea.sflag (!%p211_p12), [#allocation3], %s216_s27 }
  0x1c   : > { %s220_s30 = scalar_lea.vmem (!%p211_p12), [#allocation2], %s560_s28 }
  0x1d   : > { %721 = dma.done.wait (%p816_p7), %s217_s29, 128  }
  0x1e   : > { %723 = vsyncadd (%p816_p7), %s217_s29, 4294967168  ;;  %s561_s4 = sshll.u32 %s216_s27, 1  ;;  %s227_s5 = scalar_lea.sflag [#allocation5], %s216_s27 }
  0x1f   : > { %s850_s6 = scalar_lea.vmem [#allocation4], %s561_s4 }
  0x20   : > { %725 = dma.done.wait (%p816_p7), %s227_s5, 32  }
  0x21   : > { %727 = vsyncadd (%p816_p7), %s227_s5, 4294967264  ;;  %v285_v0 = vld [vmem:[%s220_s30] sm:$0xff]  ;;  %vm311_vm0 = vcmask 1043456   ;;  %p267_p13 = scmp.lt.s32.totalorder %s742_s15, 1  ;;  %vm282_vm1 = vcmask 3072   ;;  %v378_v37 = vlaneseq  ;;  %v752_v38 = vmov 0.0  }
  0x22   : > { %304 = vst [vmem:[#allocation1] ss:$2 sm:$0xff] %v285_v0  ;;  %v286_v39 = vld [vmem:[%s850_s6] sm:$0x3] }
  0x23   : > { %s931_s15 = smov (!%p267_p13, %s742_s15), 1  ;;  %v379_v43 = vshrl.u32 %v378_v37, 7  ;;  %v380_v44 = vperm.slane %v286_v39, 0  ;;  %v381_v47 = vperm.slane %v286_v39, 1 }
  0x24   : > { %s562_s23 = sshll.u32 %s931_s15, 2 }
  0x25   : > { %s873_s8 = scalar_lea.vmem %s918_s2, %s562_s23  ;;  %s883_s11 = scalar_lea.vmem %s919_s3, %s562_s23  ;;  %vm382_vm9 = vcmp.eq.s32.totalorder %v380_v44, %v379_v43  ;;  %vm383_vm11 = vcmp.eq.s32.totalorder %v381_v47, %v379_v43 }
  0x26   : > { %283 = vst.msk [vmem:[%s873_s8] sm:$0xf] %vm282_vm1, %v752_v38  ;;  %v386_v62 = vsel %vm382_vm9, 1.0, %v752_v38 }
  0x27   : > { %284 = vst.msk [vmem:[%s883_s11] sm:$0xf] %vm282_vm1, %v752_v38 }
  0x29   : > { %v305_v1 = vld.sshfl [vmem:[#allocation1] sm:$0xff pattern:$0x75316420]  ;;  %v306_v2 = vld.sshfl [vmem:[#allocation1 + $0x8] sm:$0xff pattern:$0x75316420] }
  0x2a   : > { %v312_v3 = vsel %vm311_vm0, %v305_v1, -inf  ;;  %v319_v4 = vsel %vm311_vm0, %v306_v2, -inf }
  0x2b   : > { %v313_v5 = vrot.slane %v312_v3, 4  ;;  %v320_v6 = vrot.slane %v319_v4, 4 }
  0x2d   : > { %v314_v7 = vmax.f32 %v312_v3, %v313_v5  ;;  %v321_v8 = vmax.f32 %v319_v4, %v320_v6 }
  0x2f   : > { %v315_v9 = vrot.slane %v314_v7, 2  ;;  %v322_v10 = vrot.slane %v321_v8, 2 }
  0x31   : > { %v316_v11 = vmax.f32 %v314_v7, %v315_v9  ;;  %v323_v12 = vmax.f32 %v321_v8, %v322_v10 }
  0x33   : > { %v317_v13 = vrot.slane %v316_v11, 1  ;;  %v324_v14 = vrot.slane %v323_v12, 1 }
  0x35   : > { %v318_v15 = vmax.f32 %v316_v11, %v317_v13  ;;  %v325_v16 = vmax.f32 %v323_v12, %v324_v14  ;;  %v388_v13 = vld [vmem:[%s873_s8] sm:$0xf] }
  0x37   : > { %v326_v17 = vsub.f32 %v305_v1, %v318_v15  ;;  %v327_v18 = vsub.f32 %v306_v2, %v325_v16  ;;  %v387_v1 = vsel %vm383_vm11, 1.0, %v752_v38  ;;  %v401_v16 = vld [vmem:[%s883_s11] sm:$0xf] }
  0x39   : > { %v328_v19 = vmul.f32 1.442695, %v326_v17  ;;  %v330_v20 = vmul.f32 1.442695, %v327_v18 }
  0x3b   : > { %628 = vpow2.f32 %v328_v19 }
  0x3c   : > { %630 = vpow2.f32 %v330_v20 }
  0x41   : > { %v629_v21 = vpop.eup %628 }
  0x42   : > { %v858_v22 = vpop.eup %630  ;;  %v332_v23 = vsel %vm311_vm0, %v629_v21, 0.0 }
  0x43   : > { %v333_v24 = vrot.slane %v332_v23, 4  ;;  %v339_v25 = vsel %vm311_vm0, %v858_v22, 0.0 }
  0x44   : > { %v340_v26 = vrot.slane %v339_v25, 4 }
  0x45   : > { %v334_v27 = vadd.f32 %v333_v24, %v332_v23 }
  0x46   : > { %v341_v28 = vadd.f32 %v340_v26, %v339_v25 }
  0x47   : > { %v335_v29 = vrot.slane %v334_v27, 2 }
  0x48   : > { %v342_v30 = vrot.slane %v341_v28, 2 }
  0x49   : > { %v336_v31 = vadd.f32 %v335_v29, %v334_v27 }
  0x4a   : > { %v343_v32 = vadd.f32 %v342_v30, %v341_v28 }
  0x4b   : > { %v337_v33 = vrot.slane %v336_v31, 1 }
  0x4c   : > { %v344_v34 = vrot.slane %v343_v32, 1 }
  0x4d   : > { %v338_v35 = vadd.f32 %v337_v33, %v336_v31 }
  0x4e   : > { %v345_v36 = vadd.f32 %v344_v34, %v343_v32 }
  0x4f   : > { %632 = vrcp.f32 %v338_v35  ;;  %vm351_vm2 = vweird.f32 %v338_v35  ;;  %v357_v45 = vand.u32 2147483648, %v338_v35  ;;  %v355_v49 = vand.u32 2147483647, %v338_v35 }
  0x50   : > { %634 = vrcp.f32 %v345_v36  ;;  %v372_v50 = vand.u32 2147483648, %v345_v36  ;;  %vm366_vm4 = vweird.f32 %v345_v36  ;;  %v370_v52 = vand.u32 2147483647, %v345_v36 }
  0x51   : > { %v358_v54 = vor.u32 1.1754944e-38, %v357_v45  ;;  %vm356_vm7 = vcmp.eq.f32.partialorder %v355_v49, 8.507059e+37 }
  0x52   : > { %v373_v57 = vor.u32 1.1754944e-38, %v372_v50  ;;  %vm371_vm10 = vcmp.eq.f32.partialorder %v370_v52, 8.507059e+37 }
  0x55   : > { %v633_v40 = vpop.eup %632 }
  0x56   : > { %v635_v41 = vpop.eup %634  ;;  %v347_v42 = vmul.f32 %v633_v40, %v338_v35  ;;  %vm352_vm3 = vweird.f32 %v633_v40 }
  0x57   : > { %v362_v46 = vmul.f32 %v635_v41, %v345_v36  ;;  %vm367_vm5 = vweird.f32 %v635_v41  ;;  %vm353_vm6 = vmor %vm351_vm2, %vm352_vm3 }
  0x58   : > { %v348_v48 = vsub.f32 1.0, %v347_v42  ;;  %vm368_vm8 = vmor %vm366_vm4, %vm367_vm5 }
  0x59   : > { %v363_v51 = vsub.f32 1.0, %v362_v46 }
  0x5a   : > { %v349_v53 = vmul.f32 %v633_v40, %v348_v48 }
  0x5b   : > { %v364_v55 = vmul.f32 %v635_v41, %v363_v51 }
  0x5c   : > { %v350_v56 = vadd.f32 %v633_v40, %v349_v53 }
  0x5d   : > { %v365_v58 = vadd.f32 %v635_v41, %v364_v55 }
  0x5e   : > { %v354_v59 = vsel %vm353_vm6, %v633_v40, %v350_v56 }
  0x5f   : > { %v359_v60 = vsel %vm356_vm7, %v358_v54, %v354_v59  ;;  %v369_v61 = vsel %vm368_vm8, %v635_v41, %v365_v58 }
  0x60   : > { %v360_v63 = vmul.f32 %v629_v21, %v359_v60  ;;  %v374_v0 = vsel %vm371_vm10, %v373_v57, %v369_v61 }
  0x61   : > { %v375_v2 = vmul.f32 %v858_v22, %v374_v0 }
  0x62   : > { %v389_v3 = vmul.f32 %v386_v62, %v360_v63  ;;  %v399_v7 = vadd.f32 %v386_v62, %v360_v63 }
  0x63   : > { %v390_v4 = vmul.f32 %v387_v1, %v375_v2  ;;  %v400_v8 = vadd.f32 %v387_v1, %v375_v2 }
  0x64   : > { %v391_v5 = vsel %vm311_vm0, %v389_v3, 0.0  ;;  %v402_v10 = vsel %vm311_vm0, %v399_v7, 0.0 }
  0x65   : > { %v392_v6 = vsel %vm311_vm0, %v390_v4, 0.0  ;;  %v403_v11 = vsel %vm311_vm0, %v400_v8, 0.0 }
  0x66   : > { %v393_v9 = vadd.f32 %v392_v6, %v391_v5  ;;  %v404_v12 = vadd.f32 %v403_v11, %v402_v10 }
  0x68   : > { %394 = vadd.xlane.f32.xlu0 %v393_v9 }
  0x70   : > { %405 = vadd.xlane.f32.xlu0 %v404_v12 }
  0xdb   : > { %v395_v14 = vpop.xlane.xlu0 %394 }
  0xdc   : > { %v396_v15 = vadd.f32 %v395_v14, %v388_v13 }
  0xde   : > { %398 = vst.msk [vmem:[%s873_s8] sm:$0xf] %vm282_vm1, %v396_v15 }
  0xe3   : > { %v406_v17 = vpop.xlane.xlu0 %405 }
  0xe4   : > { %v407_v18 = vadd.f32 %v406_v17, %v401_v16 }
  0xe6   : > { %408 = vst.msk [vmem:[%s883_s11] sm:$0xf] %vm282_vm1, %v407_v18 }
  0xe7 PF: > { %s20_s17 = sadd.s32 1, %s750_s17   ;;  %s923_s12 = smov %s734_s13 }
  0xe8   : > { %p17_p0 = scmp.ge.s32.totalorder %s20_s17, 4   ;;  %s924_s13 = smov %s738_s14 }
  0xe9   : > { %s925_s14 = smov %s822_s24  ;;  %s926_s15 = smov %s746_s16 }
  0xea   : > { %s927_s16 = smov %s929_s19  ;;  %19 = sbr.rel (!%p17_p0) target bundleno = 6 (0x6), region = 97 }
  0xef   :  { %448 = vsyncpa [#allocation3], 1 }
  0xf0   :  { %450 = vsyncpa [#allocation3 + $0x1], 1 }
  0xf1   :  { %451 = vsyncpa [#allocation5], 1 }
  0xf2   :  { %453 = vsyncpa [#allocation5 + $0x1], 1 }

</bundles_post_ra>
